<compile_context>
chip_gen: v6e
topology: v6e:2x2x1
jax: 0.10.0
libtpu: 0.0.40
codegen_flags: <defaults>
</compile_context>

<pallas_src>
import functools

import jax
import jax.numpy as jnp
from jax.experimental import pallas as pl
from jax.experimental.pallas import tpu as pltpu

LN_EPS = 1e-3
SUBLANE = 16  # sublane quantum for bf16 inputs (also a multiple of the f32 quantum 8)


def _round_up(x, m):
    return (x + m - 1) // m * m


def _ceil_div(a, b):
    return -(-a // b)


def tpu_config():
    """Per-generation tiling / precision knobs (lane pad, batch tile, VMEM cap,
    bf16 activation math, >=2 batch tiles for v7x megacore)."""
    kind = ""
    try:
        kind = jax.devices()[0].device_kind.lower()
    except Exception:
        pass
    gen = 0
    for g in (7, 6, 5, 4, 3, 2):
        if f"v{g}" in kind or f"tpu{g}" in kind:
            gen = g
            break
    if gen >= 7:   # v7x: 64 MiB VMEM, 2 TC/chip, 256x256 MXU, bf16 VPU/EUP
        return dict(lane=256, tile_batch=512, vmem_limit_bytes=48 * 1024 * 1024,
                    force_two_tiles=True, act_dtype=jnp.bfloat16)
    if gen == 6:   # v6e: 128 MiB VMEM, 256x256 MXU, bf16 VPU/EUP
        return dict(lane=256, tile_batch=1024, vmem_limit_bytes=100 * 1024 * 1024,
                    force_two_tiles=False, act_dtype=jnp.bfloat16)
    if gen == 5:   # v5e/v5p: 128 MiB VMEM, 128x128 MXU, no bf16 VPU/EUP
        return dict(lane=128, tile_batch=1024, vmem_limit_bytes=100 * 1024 * 1024,
                    force_two_tiles=False, act_dtype=jnp.float32)
    # Unknown / older generations: conservative defaults.
    return dict(lane=128, tile_batch=256, vmem_limit_bytes=None,
                force_two_tiles=False, act_dtype=jnp.float32)


def mlp_kernel(x_ref,
               w0_ref, g0_ref, b0_ref,
               w1_ref, g1_ref, b1_ref,
               wm_ref, bm_ref,
               out_ref, *, units, act_dtype):
    """One batch tile of: [Linear -> LayerNorm(eps=1e-3) -> SiLU] x2 -> Linear(+bias) -> tanh.

    Feature dims are zero-padded to lane multiples by the wrapper; `units` is the
    UNPADDED hidden width (LayerNorm divisor). Zero-padded gamma/beta/bias keep the
    padded lanes exactly 0 through LN, SiLU and the following matmuls.
    """
    inv_n = jnp.float32(1.0 / units)

    def ln_silu(h, gamma, beta):
        # Fused single-pass LayerNorm stats: one sum + one sum-of-squares per row.
        s = jnp.sum(h, axis=-1, keepdims=True)
        s2 = jnp.sum(h * h, axis=-1, keepdims=True)
        mu = s * inv_n
        var = jnp.maximum(s2 * inv_n - mu * mu, 0.0)
        hn = ((h - mu) * jax.lax.rsqrt(var + LN_EPS) * gamma + beta).astype(act_dtype)
        # SiLU with a single transcendental: x*sigmoid(x) == 0.5*x*(1 + tanh(x/2)).
        return (0.5 * hn) * (1.0 + jnp.tanh(0.5 * hn))

    # Hidden layer 0: Linear(no bias) -> LayerNorm -> SiLU
    h = jnp.dot(x_ref[...], w0_ref[...], preferred_element_type=jnp.float32)
    h = ln_silu(h, g0_ref[...], b0_ref[...])

    # Hidden layer 1
    h = jnp.dot(h.astype(jnp.bfloat16), w1_ref[...],
                preferred_element_type=jnp.float32)
    h = ln_silu(h, g1_ref[...], b1_ref[...])

    # mean_layer (Linear with bias) then tanh (dist == 'normal')
    m = jnp.dot(h.astype(jnp.bfloat16), wm_ref[...],
                preferred_element_type=jnp.float32) + bm_ref[...]
    out_ref[...] = jnp.tanh(m.astype(act_dtype)).astype(out_ref.dtype)


def init_params(key, inp_dim, units, out_dim, dtype=jnp.float32):
    """Deterministic synthetic parameters (shapes match the PyTorch module)."""
    ks = jax.random.split(key, 4)
    scale0 = 1.0 / jnp.sqrt(inp_dim)
    scale1 = 1.0 / jnp.sqrt(units)
    return {
        # Linear weights stored as (in, out) == PyTorch weight.T
        "w0": jax.random.normal(ks[0], (inp_dim, units), dtype) * scale0,
        "g0": jnp.ones((1, units), dtype),
        "b0": jnp.zeros((1, units), dtype),
        "w1": jax.random.normal(ks[1], (units, units), dtype) * scale1,
        "g1": jnp.ones((1, units), dtype),
        "b1": jnp.zeros((1, units), dtype),
        "wm": jax.random.normal(ks[2], (units, out_dim), dtype) * scale1,
        "bm": jax.random.normal(ks[3], (1, out_dim), dtype) * 0.01,
    }


def prepare_params(params, *, lane):
    """Pad + cast the weights ONCE (hoisted out of the per-call path).

    Matmul weights -> zero-padded bf16; LN gamma/beta and output bias -> zero-padded f32.
    """
    inp, units = params["w0"].shape
    out_dim = params["wm"].shape[1]
    inp_p = _round_up(inp, lane)
    units_p = _round_up(units, lane)
    out_p = _round_up(out_dim, lane)

    def pad2(a, rows, cols, dtype):
        a = jnp.asarray(a, jnp.float32)
        a = jnp.pad(a, ((0, rows - a.shape[0]), (0, cols - a.shape[1])))
        return a.astype(dtype)

    prepared = {
        "w0": pad2(params["w0"], inp_p, units_p, jnp.bfloat16),
        "g0": pad2(params["g0"], 1, units_p, jnp.float32),
        "b0": pad2(params["b0"], 1, units_p, jnp.float32),
        "w1": pad2(params["w1"], units_p, units_p, jnp.bfloat16),
        "g1": pad2(params["g1"], 1, units_p, jnp.float32),
        "b1": pad2(params["b1"], 1, units_p, jnp.float32),
        "wm": pad2(params["wm"], units_p, out_p, jnp.bfloat16),
        "bm": pad2(params["bm"], 1, out_p, jnp.float32),
    }
    meta = dict(inp=inp, units=units, out_dim=out_dim,
                inp_p=inp_p, units_p=units_p, out_p=out_p)
    return prepared, meta


def mlp_forward(prepared, meta, x, *, cfg=None, min_std=0.1, max_std=1.0, std=1.0,
                out_dtype=None):
    """Returns (mean, std) parameterizing Normal(tanh(mean_layer(h)), std)."""
    cfg = tpu_config() if cfg is None else cfg
    B, inp = x.shape
    assert inp == meta["inp"], (inp, meta["inp"])
    units, out_dim = meta["units"], meta["out_dim"]
    inp_p, units_p, out_p = meta["inp_p"], meta["units_p"], meta["out_p"]
    out_dtype = x.dtype if out_dtype is None else out_dtype

    # Batch tiling: minimize padding (tb = round_up(ceil(B/n_tiles), SUBLANE));
    # on v7x force an even number of >=2 tiles so both TensorCores are used.
    n_tiles = max(1, _ceil_div(B, cfg["tile_batch"]))
    if cfg["force_two_tiles"] and B >= 2 * SUBLANE:
        n_tiles = max(n_tiles, 2)
        n_tiles += n_tiles % 2
    tb = _round_up(_ceil_div(B, n_tiles), SUBLANE)
    b_p = n_tiles * tb

    # Only the activation is padded / cast per call; weights were prepared once.
    xp = jnp.pad(x.astype(jnp.float32),
                 ((0, b_p - B), (0, inp_p - inp))).astype(jnp.bfloat16)

    weight_args = (prepared["w0"], prepared["g0"], prepared["b0"],
                   prepared["w1"], prepared["g1"], prepared["b1"],
                   prepared["wm"], prepared["bm"])

    cost = pl.CostEstimate(
        flops=2 * b_p * (inp_p * units_p + units_p * units_p + units_p * out_p),
        transcendentals=b_p * (2 * units_p + out_p),
        bytes_accessed=int(xp.size) * xp.dtype.itemsize
        + sum(int(a.size) * a.dtype.itemsize for a in weight_args)
        + b_p * out_p * jnp.dtype(out_dtype).itemsize,
    )

    def build_and_call(single_buffer_weights):
        def resident(arr):
            # Constant block index: DMA'd once, VMEM-resident across all batch tiles.
            if single_buffer_weights:
                return pl.BlockSpec(arr.shape, lambda i: (0, 0),
                                    pipeline_mode=pl.Buffered(1))
            return pl.BlockSpec(arr.shape, lambda i: (0, 0))

        return pl.pallas_call(
            functools.partial(mlp_kernel, units=units, act_dtype=cfg["act_dtype"]),
            out_shape=jax.ShapeDtypeStruct((b_p, out_p), out_dtype),
            grid=(n_tiles,),
            in_specs=[pl.BlockSpec((tb, inp_p), lambda i: (i, 0))]
                     + [resident(a) for a in weight_args],
            out_specs=pl.BlockSpec((tb, out_p), lambda i: (i, 0)),
            compiler_params=pltpu.CompilerParams(
                dimension_semantics=("parallel",),
                vmem_limit_bytes=cfg["vmem_limit_bytes"],
            ),
            cost_estimate=cost,
        )(xp, *weight_args)

    try:
        mean_full = build_and_call(True)
    except Exception:
        # Older jax without single-buffer (Buffered(1)) support: default double-buffer.
        mean_full = build_and_call(False)

    mean = mean_full[:B, :out_dim]

    # dist == 'normal', std is the fixed tensor 1.0 (not 'learned'):
    std_val = (max_std - min_std) * jax.nn.sigmoid(jnp.float32(std) + 2.0) + min_std
    # TODO(synk): torch wraps these in ContDist(Independent(Normal(tanh(mean), std), 1));
    # here we return the (mean, std) tensors that parameterize it.
    return mean, std_val


def mlp_reference(params, x):
    """Pure-JAX f32 reference of the same forward pass (for validation)."""
    h = x.astype(jnp.float32)
    for w, g, b in ((params["w0"], params["g0"], params["b0"]),
                    (params["w1"], params["g1"], params["b1"])):
        h = h @ w
        mu = h.mean(-1, keepdims=True)
        var = ((h - mu) ** 2).mean(-1, keepdims=True)
        h = (h - mu) * jax.lax.rsqrt(var + LN_EPS) * g + b
        h = h * jax.nn.sigmoid(h)
    return jnp.tanh(h @ params["wm"] + params["bm"])


if __name__ == "__main__":
    key = jax.random.PRNGKey(0)
    k_x, k_p = jax.random.split(key)

    B, INP, UNITS, OUT = 8, 16, 32, 8   # batch=8, inp_dim=16, units=32, shape=(8,)
    x = jax.random.normal(k_x, (B, INP), jnp.float32)
    params = init_params(k_p, INP, UNITS, OUT)

    cfg = tpu_config()
    # Hoisted out of the per-call path: padding + bf16 cast of the weights, done once.
    prepared, meta = prepare_params(params, lane=cfg["lane"])

    mean, std = mlp_forward(prepared, meta, x, cfg=cfg)
    jax.block_until_ready(mean)
    jax.block_until_ready(std)

    assert mean.shape == (B, OUT)
    assert bool(jnp.all(jnp.isfinite(mean)))

    ref = mlp_reference(params, x)
    err = float(jnp.max(jnp.abs(mean.astype(jnp.float32) - ref)))
    assert err < 5e-2, f"mismatch vs reference: {err}"

    print("KERNEL_OK")
</pallas_src>

<mosaic_0001>
module attributes {stable_mosaic.version = 11 : i64} {
  func.func @mlp_kernel(%arg0: i32, %arg1: memref<16x128xbf16, #tpu.memory_space<vmem>>, %arg2: memref<128x128xbf16, #tpu.memory_space<vmem>>, %arg3: memref<1x128xf32, #tpu.memory_space<vmem>>, %arg4: memref<1x128xf32, #tpu.memory_space<vmem>>, %arg5: memref<128x128xbf16, #tpu.memory_space<vmem>>, %arg6: memref<1x128xf32, #tpu.memory_space<vmem>>, %arg7: memref<1x128xf32, #tpu.memory_space<vmem>>, %arg8: memref<128x128xbf16, #tpu.memory_space<vmem>>, %arg9: memref<1x128xf32, #tpu.memory_space<vmem>>, %arg10: memref<16x128xf32, #tpu.memory_space<vmem>>) attributes {dimension_semantics = [#tpu.dimension_semantics<parallel>], iteration_bounds = array<i64: 1>, scalar_prefetch = 0 : i64, scratch_operands = 0 : i64, tpu.core_type = #tpu.core_type<tc>, window_params = [{transform_indices = @transform_0, window_bounds = array<i64: 16, 128>}, {pipeline_mode = #tpu.pipeline_mode<synchronous>, transform_indices = @transform_1, window_bounds = array<i64: 128, 128>}, {pipeline_mode = #tpu.pipeline_mode<synchronous>, transform_indices = @transform_2, window_bounds = array<i64: 1, 128>}, {pipeline_mode = #tpu.pipeline_mode<synchronous>, transform_indices = @transform_3, window_bounds = array<i64: 1, 128>}, {pipeline_mode = #tpu.pipeline_mode<synchronous>, transform_indices = @transform_4, window_bounds = array<i64: 128, 128>}, {pipeline_mode = #tpu.pipeline_mode<synchronous>, transform_indices = @transform_5, window_bounds = array<i64: 1, 128>}, {pipeline_mode = #tpu.pipeline_mode<synchronous>, transform_indices = @transform_6, window_bounds = array<i64: 1, 128>}, {pipeline_mode = #tpu.pipeline_mode<synchronous>, transform_indices = @transform_7, window_bounds = array<i64: 128, 128>}, {pipeline_mode = #tpu.pipeline_mode<synchronous>, transform_indices = @transform_8, window_bounds = array<i64: 1, 128>}, {transform_indices = @transform_9, window_bounds = array<i64: 16, 128>}]} {
    %c0 = arith.constant 0 : index
    %c0_0 = arith.constant 0 : index
    %0 = vector.load %arg1[%c0, %c0_0] : memref<16x128xbf16, #tpu.memory_space<vmem>>, vector<16x128xbf16>
    %c0_1 = arith.constant 0 : index
    %c0_2 = arith.constant 0 : index
    %1 = vector.load %arg2[%c0_1, %c0_2] : memref<128x128xbf16, #tpu.memory_space<vmem>>, vector<128x128xbf16>
    %cst = arith.constant dense<0.000000e+00> : vector<16x128xf32>
    %2 = tpu.matmul %0, %1, %cst {dimension_numbers = #tpu.dot_dimension_numbers<[1], [0], [0], [1], [0, 0, 1, 1], [], []>} : vector<16x128xbf16>, vector<128x128xbf16>, vector<16x128xf32> -> vector<16x128xf32>
    %c0_3 = arith.constant 0 : index
    %c0_4 = arith.constant 0 : index
    %3 = vector.load %arg3[%c0_3, %c0_4] : memref<1x128xf32, #tpu.memory_space<vmem>>, vector<1x128xf32>
    %c0_5 = arith.constant 0 : index
    %c0_6 = arith.constant 0 : index
    %4 = vector.load %arg4[%c0_5, %c0_6] : memref<1x128xf32, #tpu.memory_space<vmem>>, vector<1x128xf32>
    %cst_7 = arith.constant dense<0.000000e+00> : vector<16xf32>
    %5 = vector.multi_reduction <add>, %2, %cst_7 [1] : vector<16x128xf32> to vector<16xf32>
    %6 = vector.shape_cast %5 : vector<16xf32> to vector<16x1xf32>
    %7 = arith.mulf %2, %2 : vector<16x128xf32>
    %cst_8 = arith.constant dense<0.000000e+00> : vector<16xf32>
    %8 = vector.multi_reduction <add>, %7, %cst_8 [1] : vector<16x128xf32> to vector<16xf32>
    %9 = vector.shape_cast %8 : vector<16xf32> to vector<16x1xf32>
    %cst_9 = arith.constant 3.125000e-02 : f32
    %10 = vector.broadcast %cst_9 : f32 to vector<16x1xf32>
    %11 = arith.mulf %6, %10 : vector<16x1xf32>
    %cst_10 = arith.constant 3.125000e-02 : f32
    %12 = vector.broadcast %cst_10 : f32 to vector<16x1xf32>
    %13 = arith.mulf %9, %12 : vector<16x1xf32>
    %14 = arith.mulf %11, %11 : vector<16x1xf32>
    %15 = arith.subf %13, %14 : vector<16x1xf32>
    %cst_11 = arith.constant 0.000000e+00 : f32
    %16 = vector.broadcast %cst_11 : f32 to vector<16x1xf32>
    %17 = arith.maximumf %15, %16 : vector<16x1xf32>
    %18 = vector.broadcast %11 : vector<16x1xf32> to vector<16x128xf32>
    %19 = arith.subf %2, %18 : vector<16x128xf32>
    %cst_12 = arith.constant 1.000000e-03 : f32
    %20 = vector.broadcast %cst_12 : f32 to vector<16x1xf32>
    %21 = arith.addf %17, %20 : vector<16x1xf32>
    %22 = math.rsqrt %21 : vector<16x1xf32>
    %23 = vector.broadcast %22 : vector<16x1xf32> to vector<16x128xf32>
    %24 = arith.mulf %19, %23 : vector<16x128xf32>
    %25 = vector.broadcast %3 : vector<1x128xf32> to vector<16x128xf32>
    %26 = arith.mulf %24, %25 : vector<16x128xf32>
    %27 = vector.broadcast %4 : vector<1x128xf32> to vector<16x128xf32>
    %28 = arith.addf %26, %27 : vector<16x128xf32>
    %cst_13 = arith.constant 5.000000e-01 : f32
    %29 = vector.broadcast %cst_13 : f32 to vector<16x128xf32>
    %30 = arith.mulf %29, %28 : vector<16x128xf32>
    %cst_14 = arith.constant 5.000000e-01 : f32
    %31 = vector.broadcast %cst_14 : f32 to vector<16x128xf32>
    %32 = arith.mulf %31, %28 : vector<16x128xf32>
    %33 = math.tanh %32 : vector<16x128xf32>
    %cst_15 = arith.constant 1.000000e+00 : f32
    %34 = vector.broadcast %cst_15 : f32 to vector<16x128xf32>
    %35 = arith.addf %34, %33 : vector<16x128xf32>
    %36 = arith.mulf %30, %35 : vector<16x128xf32>
    %37 = arith.truncf %36 : vector<16x128xf32> to vector<16x128xbf16>
    %c0_16 = arith.constant 0 : index
    %c0_17 = arith.constant 0 : index
    %38 = vector.load %arg5[%c0_16, %c0_17] : memref<128x128xbf16, #tpu.memory_space<vmem>>, vector<128x128xbf16>
    %cst_18 = arith.constant dense<0.000000e+00> : vector<16x128xf32>
    %39 = tpu.matmul %37, %38, %cst_18 {dimension_numbers = #tpu.dot_dimension_numbers<[1], [0], [0], [1], [0, 0, 1, 1], [], []>} : vector<16x128xbf16>, vector<128x128xbf16>, vector<16x128xf32> -> vector<16x128xf32>
    %c0_19 = arith.constant 0 : index
    %c0_20 = arith.constant 0 : index
    %40 = vector.load %arg6[%c0_19, %c0_20] : memref<1x128xf32, #tpu.memory_space<vmem>>, vector<1x128xf32>
    %c0_21 = arith.constant 0 : index
    %c0_22 = arith.constant 0 : index
    %41 = vector.load %arg7[%c0_21, %c0_22] : memref<1x128xf32, #tpu.memory_space<vmem>>, vector<1x128xf32>
    %cst_23 = arith.constant dense<0.000000e+00> : vector<16xf32>
    %42 = vector.multi_reduction <add>, %39, %cst_23 [1] : vector<16x128xf32> to vector<16xf32>
    %43 = vector.shape_cast %42 : vector<16xf32> to vector<16x1xf32>
    %44 = arith.mulf %39, %39 : vector<16x128xf32>
    %cst_24 = arith.constant dense<0.000000e+00> : vector<16xf32>
    %45 = vector.multi_reduction <add>, %44, %cst_24 [1] : vector<16x128xf32> to vector<16xf32>
    %46 = vector.shape_cast %45 : vector<16xf32> to vector<16x1xf32>
    %cst_25 = arith.constant 3.125000e-02 : f32
    %47 = vector.broadcast %cst_25 : f32 to vector<16x1xf32>
    %48 = arith.mulf %43, %47 : vector<16x1xf32>
    %cst_26 = arith.constant 3.125000e-02 : f32
    %49 = vector.broadcast %cst_26 : f32 to vector<16x1xf32>
    %50 = arith.mulf %46, %49 : vector<16x1xf32>
    %51 = arith.mulf %48, %48 : vector<16x1xf32>
    %52 = arith.subf %50, %51 : vector<16x1xf32>
    %cst_27 = arith.constant 0.000000e+00 : f32
    %53 = vector.broadcast %cst_27 : f32 to vector<16x1xf32>
    %54 = arith.maximumf %52, %53 : vector<16x1xf32>
    %55 = vector.broadcast %48 : vector<16x1xf32> to vector<16x128xf32>
    %56 = arith.subf %39, %55 : vector<16x128xf32>
    %cst_28 = arith.constant 1.000000e-03 : f32
    %57 = vector.broadcast %cst_28 : f32 to vector<16x1xf32>
    %58 = arith.addf %54, %57 : vector<16x1xf32>
    %59 = math.rsqrt %58 : vector<16x1xf32>
    %60 = vector.broadcast %59 : vector<16x1xf32> to vector<16x128xf32>
    %61 = arith.mulf %56, %60 : vector<16x128xf32>
    %62 = vector.broadcast %40 : vector<1x128xf32> to vector<16x128xf32>
    %63 = arith.mulf %61, %62 : vector<16x128xf32>
    %64 = vector.broadcast %41 : vector<1x128xf32> to vector<16x128xf32>
    %65 = arith.addf %63, %64 : vector<16x128xf32>
    %cst_29 = arith.constant 5.000000e-01 : f32
    %66 = vector.broadcast %cst_29 : f32 to vector<16x128xf32>
    %67 = arith.mulf %66, %65 : vector<16x128xf32>
    %cst_30 = arith.constant 5.000000e-01 : f32
    %68 = vector.broadcast %cst_30 : f32 to vector<16x128xf32>
    %69 = arith.mulf %68, %65 : vector<16x128xf32>
    %70 = math.tanh %69 : vector<16x128xf32>
    %cst_31 = arith.constant 1.000000e+00 : f32
    %71 = vector.broadcast %cst_31 : f32 to vector<16x128xf32>
    %72 = arith.addf %71, %70 : vector<16x128xf32>
    %73 = arith.mulf %67, %72 : vector<16x128xf32>
    %74 = arith.truncf %73 : vector<16x128xf32> to vector<16x128xbf16>
    %c0_32 = arith.constant 0 : index
    %c0_33 = arith.constant 0 : index
    %75 = vector.load %arg8[%c0_32, %c0_33] : memref<128x128xbf16, #tpu.memory_space<vmem>>, vector<128x128xbf16>
    %cst_34 = arith.constant dense<0.000000e+00> : vector<16x128xf32>
    %76 = tpu.matmul %74, %75, %cst_34 {dimension_numbers = #tpu.dot_dimension_numbers<[1], [0], [0], [1], [0, 0, 1, 1], [], []>} : vector<16x128xbf16>, vector<128x128xbf16>, vector<16x128xf32> -> vector<16x128xf32>
    %c0_35 = arith.constant 0 : index
    %c0_36 = arith.constant 0 : index
    %77 = vector.load %arg9[%c0_35, %c0_36] : memref<1x128xf32, #tpu.memory_space<vmem>>, vector<1x128xf32>
    %78 = vector.broadcast %77 : vector<1x128xf32> to vector<16x128xf32>
    %79 = arith.addf %76, %78 : vector<16x128xf32>
    %80 = math.tanh %79 : vector<16x128xf32>
    %c0_37 = arith.constant 0 : index
    %c0_38 = arith.constant 0 : index
    %81 = vector.load %arg10[%c0_37, %c0_38] : memref<16x128xf32, #tpu.memory_space<vmem>>, vector<16x128xf32>
    tpu.vector_store %arg10[%c0_37, %c0_38], %80 {strides = array<i32>} : memref<16x128xf32, #tpu.memory_space<vmem>>, vector<16x128xf32>,
    return
  }
  func.func @transform_0(%arg0: i32) -> (i32, i32) {
    %c0_i32 = arith.constant 0 : i32
    %c0_i32_0 = arith.constant 0 : i32
    return %arg0, %c0_i32 : i32, i32
  }
  func.func @transform_1(%arg0: i32) -> (i32, i32) {
    %c0_i32 = arith.constant 0 : i32
    %c0_i32_0 = arith.constant 0 : i32
    %c0_i32_1 = arith.constant 0 : i32
    return %c0_i32, %c0_i32_0 : i32, i32
  }
  func.func @transform_2(%arg0: i32) -> (i32, i32) {
    %c0_i32 = arith.constant 0 : i32
    %c0_i32_0 = arith.constant 0 : i32
    %c0_i32_1 = arith.constant 0 : i32
    return %c0_i32, %c0_i32_0 : i32, i32
  }
  func.func @transform_3(%arg0: i32) -> (i32, i32) {
    %c0_i32 = arith.constant 0 : i32
    %c0_i32_0 = arith.constant 0 : i32
    %c0_i32_1 = arith.constant 0 : i32
    return %c0_i32, %c0_i32_0 : i32, i32
  }
  func.func @transform_4(%arg0: i32) -> (i32, i32) {
    %c0_i32 = arith.constant 0 : i32
    %c0_i32_0 = arith.constant 0 : i32
    %c0_i32_1 = arith.constant 0 : i32
    return %c0_i32, %c0_i32_0 : i32, i32
  }
  func.func @transform_5(%arg0: i32) -> (i32, i32) {
    %c0_i32 = arith.constant 0 : i32
    %c0_i32_0 = arith.constant 0 : i32
    %c0_i32_1 = arith.constant 0 : i32
    return %c0_i32, %c0_i32_0 : i32, i32
  }
  func.func @transform_6(%arg0: i32) -> (i32, i32) {
    %c0_i32 = arith.constant 0 : i32
    %c0_i32_0 = arith.constant 0 : i32
    %c0_i32_1 = arith.constant 0 : i32
    return %c0_i32, %c0_i32_0 : i32, i32
  }
  func.func @transform_7(%arg0: i32) -> (i32, i32) {
    %c0_i32 = arith.constant 0 : i32
    %c0_i32_0 = arith.constant 0 : i32
    %c0_i32_1 = arith.constant 0 : i32
    return %c0_i32, %c0_i32_0 : i32, i32
  }
  func.func @transform_8(%arg0: i32) -> (i32, i32) {
    %c0_i32 = arith.constant 0 : i32
    %c0_i32_0 = arith.constant 0 : i32
    %c0_i32_1 = arith.constant 0 : i32
    return %c0_i32, %c0_i32_0 : i32, i32
  }
  func.func @transform_9(%arg0: i32) -> (i32, i32) {
    %c0_i32 = arith.constant 0 : i32
    %c0_i32_0 = arith.constant 0 : i32
    return %arg0, %c0_i32 : i32, i32
  }
}

module attributes {stable_mosaic.version = 11 : i64} {
  func.func @mlp_kernel(%arg0: i32, %arg1: memref<16x128xbf16, #tpu.memory_space<vmem>>, %arg2: memref<128x128xbf16, #tpu.memory_space<vmem>>, %arg3: memref<1x128xf32, #tpu.memory_space<vmem>>, %arg4: memref<1x128xf32, #tpu.memory_space<vmem>>, %arg5: memref<128x128xbf16, #tpu.memory_space<vmem>>, %arg6: memref<1x128xf32, #tpu.memory_space<vmem>>, %arg7: memref<1x128xf32, #tpu.memory_space<vmem>>, %arg8: memref<128x128xbf16, #tpu.memory_space<vmem>>, %arg9: memref<1x128xf32, #tpu.memory_space<vmem>>, %arg10: memref<16x128xf32, #tpu.memory_space<vmem>>) attributes {dimension_semantics = [#tpu.dimension_semantics<parallel>], iteration_bounds = array<i64: 1>, scalar_prefetch = 0 : i64, scratch_operands = 0 : i64, tpu.core_type = #tpu.core_type<tc>, window_params = [{transform_indices = @transform_0, window_bounds = array<i64: 16, 128>}, {pipeline_mode = #tpu.pipeline_mode<synchronous>, transform_indices = @transform_1, window_bounds = array<i64: 128, 128>}, {pipeline_mode = #tpu.pipeline_mode<synchronous>, transform_indices = @transform_2, window_bounds = array<i64: 1, 128>}, {pipeline_mode = #tpu.pipeline_mode<synchronous>, transform_indices = @transform_3, window_bounds = array<i64: 1, 128>}, {pipeline_mode = #tpu.pipeline_mode<synchronous>, transform_indices = @transform_4, window_bounds = array<i64: 128, 128>}, {pipeline_mode = #tpu.pipeline_mode<synchronous>, transform_indices = @transform_5, window_bounds = array<i64: 1, 128>}, {pipeline_mode = #tpu.pipeline_mode<synchronous>, transform_indices = @transform_6, window_bounds = array<i64: 1, 128>}, {pipeline_mode = #tpu.pipeline_mode<synchronous>, transform_indices = @transform_7, window_bounds = array<i64: 128, 128>}, {pipeline_mode = #tpu.pipeline_mode<synchronous>, transform_indices = @transform_8, window_bounds = array<i64: 1, 128>}, {transform_indices = @transform_9, window_bounds = array<i64: 16, 128>}]} {
    %c0 = arith.constant 0 : index
    %c0_0 = arith.constant 0 : index
    %0 = vector.load %arg1[%c0, %c0_0] : memref<16x128xbf16, #tpu.memory_space<vmem>>, vector<16x128xbf16>
    %c0_1 = arith.constant 0 : index
    %c0_2 = arith.constant 0 : index
    %1 = vector.load %arg2[%c0_1, %c0_2] : memref<128x128xbf16, #tpu.memory_space<vmem>>, vector<128x128xbf16>
    %cst = arith.constant dense<0.000000e+00> : vector<16x128xf32>
    %2 = tpu.matmul %0, %1, %cst {dimension_numbers = #tpu.dot_dimension_numbers<[1], [0], [0], [1], [0, 0, 1, 1], [], []>} : vector<16x128xbf16>, vector<128x128xbf16>, vector<16x128xf32> -> vector<16x128xf32>
    %c0_3 = arith.constant 0 : index
    %c0_4 = arith.constant 0 : index
    %3 = vector.load %arg3[%c0_3, %c0_4] : memref<1x128xf32, #tpu.memory_space<vmem>>, vector<1x128xf32>
    %c0_5 = arith.constant 0 : index
    %c0_6 = arith.constant 0 : index
    %4 = vector.load %arg4[%c0_5, %c0_6] : memref<1x128xf32, #tpu.memory_space<vmem>>, vector<1x128xf32>
    %cst_7 = arith.constant dense<0.000000e+00> : vector<16xf32>
    %5 = vector.multi_reduction <add>, %2, %cst_7 [1] : vector<16x128xf32> to vector<16xf32>
    %6 = vector.shape_cast %5 : vector<16xf32> to vector<16x1xf32>
    %7 = arith.mulf %2, %2 : vector<16x128xf32>
    %cst_8 = arith.constant dense<0.000000e+00> : vector<16xf32>
    %8 = vector.multi_reduction <add>, %7, %cst_8 [1] : vector<16x128xf32> to vector<16xf32>
    %9 = vector.shape_cast %8 : vector<16xf32> to vector<16x1xf32>
    %cst_9 = arith.constant 3.125000e-02 : f32
    %10 = vector.broadcast %cst_9 : f32 to vector<16x1xf32>
    %11 = arith.mulf %6, %10 : vector<16x1xf32>
    %cst_10 = arith.constant 3.125000e-02 : f32
    %12 = vector.broadcast %cst_10 : f32 to vector<16x1xf32>
    %13 = arith.mulf %9, %12 : vector<16x1xf32>
    %14 = arith.mulf %11, %11 : vector<16x1xf32>
    %15 = arith.subf %13, %14 : vector<16x1xf32>
    %cst_11 = arith.constant 0.000000e+00 : f32
    %16 = vector.broadcast %cst_11 : f32 to vector<16x1xf32>
    %17 = arith.maximumf %15, %16 : vector<16x1xf32>
    %18 = vector.broadcast %11 : vector<16x1xf32> to vector<16x128xf32>
    %19 = arith.subf %2, %18 : vector<16x128xf32>
    %cst_12 = arith.constant 1.000000e-03 : f32
    %20 = vector.broadcast %cst_12 : f32 to vector<16x1xf32>
    %21 = arith.addf %17, %20 : vector<16x1xf32>
    %22 = math.rsqrt %21 : vector<16x1xf32>
    %23 = vector.broadcast %22 : vector<16x1xf32> to vector<16x128xf32>
    %24 = arith.mulf %19, %23 : vector<16x128xf32>
    %25 = vector.broadcast %3 : vector<1x128xf32> to vector<16x128xf32>
    %26 = arith.mulf %24, %25 : vector<16x128xf32>
    %27 = vector.broadcast %4 : vector<1x128xf32> to vector<16x128xf32>
    %28 = arith.addf %26, %27 : vector<16x128xf32>
    %cst_13 = arith.constant 5.000000e-01 : f32
    %29 = vector.broadcast %cst_13 : f32 to vector<16x128xf32>
    %30 = arith.mulf %29, %28 : vector<16x128xf32>
    %cst_14 = arith.constant 5.000000e-01 : f32
    %31 = vector.broadcast %cst_14 : f32 to vector<16x128xf32>
    %32 = arith.mulf %31, %28 : vector<16x128xf32>
    %33 = math.tanh %32 : vector<16x128xf32>
    %cst_15 = arith.constant 1.000000e+00 : f32
    %34 = vector.broadcast %cst_15 : f32 to vector<16x128xf32>
    %35 = arith.addf %34, %33 : vector<16x128xf32>
    %36 = arith.mulf %30, %35 : vector<16x128xf32>
    %37 = arith.truncf %36 : vector<16x128xf32> to vector<16x128xbf16>
    %c0_16 = arith.constant 0 : index
    %c0_17 = arith.constant 0 : index
    %38 = vector.load %arg5[%c0_16, %c0_17] : memref<128x128xbf16, #tpu.memory_space<vmem>>, vector<128x128xbf16>
    %cst_18 = arith.constant dense<0.000000e+00> : vector<16x128xf32>
    %39 = tpu.matmul %37, %38, %cst_18 {dimension_numbers = #tpu.dot_dimension_numbers<[1], [0], [0], [1], [0, 0, 1, 1], [], []>} : vector<16x128xbf16>, vector<128x128xbf16>, vector<16x128xf32> -> vector<16x128xf32>
    %c0_19 = arith.constant 0 : index
    %c0_20 = arith.constant 0 : index
    %40 = vector.load %arg6[%c0_19, %c0_20] : memref<1x128xf32, #tpu.memory_space<vmem>>, vector<1x128xf32>
    %c0_21 = arith.constant 0 : index
    %c0_22 = arith.constant 0 : index
    %41 = vector.load %arg7[%c0_21, %c0_22] : memref<1x128xf32, #tpu.memory_space<vmem>>, vector<1x128xf32>
    %cst_23 = arith.constant dense<0.000000e+00> : vector<16xf32>
    %42 = vector.multi_reduction <add>, %39, %cst_23 [1] : vector<16x128xf32> to vector<16xf32>
    %43 = vector.shape_cast %42 : vector<16xf32> to vector<16x1xf32>
    %44 = arith.mulf %39, %39 : vector<16x128xf32>
    %cst_24 = arith.constant dense<0.000000e+00> : vector<16xf32>
    %45 = vector.multi_reduction <add>, %44, %cst_24 [1] : vector<16x128xf32> to vector<16xf32>
    %46 = vector.shape_cast %45 : vector<16xf32> to vector<16x1xf32>
    %cst_25 = arith.constant 3.125000e-02 : f32
    %47 = vector.broadcast %cst_25 : f32 to vector<16x1xf32>
    %48 = arith.mulf %43, %47 : vector<16x1xf32>
    %cst_26 = arith.constant 3.125000e-02 : f32
    %49 = vector.broadcast %cst_26 : f32 to vector<16x1xf32>
    %50 = arith.mulf %46, %49 : vector<16x1xf32>
    %51 = arith.mulf %48, %48 : vector<16x1xf32>
    %52 = arith.subf %50, %51 : vector<16x1xf32>
    %cst_27 = arith.constant 0.000000e+00 : f32
    %53 = vector.broadcast %cst_27 : f32 to vector<16x1xf32>
    %54 = arith.maximumf %52, %53 : vector<16x1xf32>
    %55 = vector.broadcast %48 : vector<16x1xf32> to vector<16x128xf32>
    %56 = arith.subf %39, %55 : vector<16x128xf32>
    %cst_28 = arith.constant 1.000000e-03 : f32
    %57 = vector.broadcast %cst_28 : f32 to vector<16x1xf32>
    %58 = arith.addf %54, %57 : vector<16x1xf32>
    %59 = math.rsqrt %58 : vector<16x1xf32>
    %60 = vector.broadcast %59 : vector<16x1xf32> to vector<16x128xf32>
    %61 = arith.mulf %56, %60 : vector<16x128xf32>
    %62 = vector.broadcast %40 : vector<1x128xf32> to vector<16x128xf32>
    %63 = arith.mulf %61, %62 : vector<16x128xf32>
    %64 = vector.broadcast %41 : vector<1x128xf32> to vector<16x128xf32>
    %65 = arith.addf %63, %64 : vector<16x128xf32>
    %cst_29 = arith.constant 5.000000e-01 : f32
    %66 = vector.broadcast %cst_29 : f32 to vector<16x128xf32>
    %67 = arith.mulf %66, %65 : vector<16x128xf32>
    %cst_30 = arith.constant 5.000000e-01 : f32
    %68 = vector.broadcast %cst_30 : f32 to vector<16x128xf32>
    %69 = arith.mulf %68, %65 : vector<16x128xf32>
    %70 = math.tanh %69 : vector<16x128xf32>
    %cst_31 = arith.constant 1.000000e+00 : f32
    %71 = vector.broadcast %cst_31 : f32 to vector<16x128xf32>
    %72 = arith.addf %71, %70 : vector<16x128xf32>
    %73 = arith.mulf %67, %72 : vector<16x128xf32>
    %74 = arith.truncf %73 : vector<16x128xf32> to vector<16x128xbf16>
    %c0_32 = arith.constant 0 : index
    %c0_33 = arith.constant 0 : index
    %75 = vector.load %arg8[%c0_32, %c0_33] : memref<128x128xbf16, #tpu.memory_space<vmem>>, vector<128x128xbf16>
    %cst_34 = arith.constant dense<0.000000e+00> : vector<16x128xf32>
    %76 = tpu.matmul %74, %75, %cst_34 {dimension_numbers = #tpu.dot_dimension_numbers<[1], [0], [0], [1], [0, 0, 1, 1], [], []>} : vector<16x128xbf16>, vector<128x128xbf16>, vector<16x128xf32> -> vector<16x128xf32>
    %c0_35 = arith.constant 0 : index
    %c0_36 = arith.constant 0 : index
    %77 = vector.load %arg9[%c0_35, %c0_36] : memref<1x128xf32, #tpu.memory_space<vmem>>, vector<1x128xf32>
    %78 = vector.broadcast %77 : vector<1x128xf32> to vector<16x128xf32>
    %79 = arith.addf %76, %78 : vector<16x128xf32>
    %80 = math.tanh %79 : vector<16x128xf32>
    %c0_37 = arith.constant 0 : index
    %c0_38 = arith.constant 0 : index
    %81 = vector.load %arg10[%c0_37, %c0_38] : memref<16x128xf32, #tpu.memory_space<vmem>>, vector<16x128xf32>
    tpu.vector_store %arg10[%c0_37, %c0_38], %80 {strides = array<i32>} : memref<16x128xf32, #tpu.memory_space<vmem>>, vector<16x128xf32>,
    return
  }
  func.func @transform_0(%arg0: i32) -> (i32, i32) {
    %c0_i32 = arith.constant 0 : i32
    %c0_i32_0 = arith.constant 0 : i32
    return %arg0, %c0_i32 : i32, i32
  }
  func.func @transform_1(%arg0: i32) -> (i32, i32) {
    %c0_i32 = arith.constant 0 : i32
    %c0_i32_0 = arith.constant 0 : i32
    %c0_i32_1 = arith.constant 0 : i32
    return %c0_i32, %c0_i32_0 : i32, i32
  }
  func.func @transform_2(%arg0: i32) -> (i32, i32) {
    %c0_i32 = arith.constant 0 : i32
    %c0_i32_0 = arith.constant 0 : i32
    %c0_i32_1 = arith.constant 0 : i32
    return %c0_i32, %c0_i32_0 : i32, i32
  }
  func.func @transform_3(%arg0: i32) -> (i32, i32) {
    %c0_i32 = arith.constant 0 : i32
    %c0_i32_0 = arith.constant 0 : i32
    %c0_i32_1 = arith.constant 0 : i32
    return %c0_i32, %c0_i32_0 : i32, i32
  }
  func.func @transform_4(%arg0: i32) -> (i32, i32) {
    %c0_i32 = arith.constant 0 : i32
    %c0_i32_0 = arith.constant 0 : i32
    %c0_i32_1 = arith.constant 0 : i32
    return %c0_i32, %c0_i32_0 : i32, i32
  }
  func.func @transform_5(%arg0: i32) -> (i32, i32) {
    %c0_i32 = arith.constant 0 : i32
    %c0_i32_0 = arith.constant 0 : i32
    %c0_i32_1 = arith.constant 0 : i32
    return %c0_i32, %c0_i32_0 : i32, i32
  }
  func.func @transform_6(%arg0: i32) -> (i32, i32) {
    %c0_i32 = arith.constant 0 : i32
    %c0_i32_0 = arith.constant 0 : i32
    %c0_i32_1 = arith.constant 0 : i32
    return %c0_i32, %c0_i32_0 : i32, i32
  }
  func.func @transform_7(%arg0: i32) -> (i32, i32) {
    %c0_i32 = arith.constant 0 : i32
    %c0_i32_0 = arith.constant 0 : i32
    %c0_i32_1 = arith.constant 0 : i32
    return %c0_i32, %c0_i32_0 : i32, i32
  }
  func.func @transform_8(%arg0: i32) -> (i32, i32) {
    %c0_i32 = arith.constant 0 : i32
    %c0_i32_0 = arith.constant 0 : i32
    %c0_i32_1 = arith.constant 0 : i32
    return %c0_i32, %c0_i32_0 : i32, i32
  }
  func.func @transform_9(%arg0: i32) -> (i32, i32) {
    %c0_i32 = arith.constant 0 : i32
    %c0_i32_0 = arith.constant 0 : i32
    return %arg0, %c0_i32 : i32, i32
  }
}

</mosaic_0001>

<bundles_post_ra>
// kernel: tpu_custom_call.1
= control target key start
LH: loop header
LB: loop body
LE: loop exit
PB: predicated region body
PF: predicated region fallthrough
CT: control target
= control target key end

     0   :  { %14 = vsyncpa [#allocation3], 0  ;;  %s966_s0 = inlined_call_operand.hbm [shape: bf16[16,128], index: 0, kind: input, shape index: {}]   ;;  %s967_s1 = inlined_call_operand.hbm [shape: bf16[128,128], index: 1, kind: input, shape index: {}]   ;;  %s968_s2 = inlined_call_operand.vmem [shape: f32[1,128], index: 2, kind: input, shape index: {}]   ;;  %s969_s3 = inlined_call_operand.vmem [shape: f32[1,128], index: 3, kind: input, shape index: {}]   ;;  %s970_s4 = inlined_call_operand.hbm [shape: bf16[128,128], index: 4, kind: input, shape index: {}]   ;;  %s971_s5 = inlined_call_operand.vmem [shape: f32[1,128], index: 5, kind: input, shape index: {}]   ;;  %s972_s6 = inlined_call_operand.vmem [shape: f32[1,128], index: 6, kind: input, shape index: {}]   ;;  %s973_s7 = inlined_call_operand.hbm [shape: bf16[128,128], index: 7, kind: input, shape index: {}]   ;;  %s974_s8 = inlined_call_operand.vmem [shape: f32[1,128], index: 8, kind: input, shape index: {}]   ;;  %s975_s9 = inlined_call_operand.hbm [shape: f32[16,128], index: 9, kind: output, shape index: {}]  }
   0x1   :  { %15 = vsyncpa [#allocation6], 0 }
   0x2   :  { %16 = vsyncpa [#allocation9], 0 }
   0x3   :  { %17 = vsyncpa [#allocation4], 0  ;;  %s833_s30 = smov [#allocation5]   ;;  %s834_s11 = smov [#allocation2]  }
   0x4   :  { %s35_s10 = sshll.u32 %s833_s30, 4  ;;  %s23_s12 = sshll.u32 %s834_s11, 4  ;;  %s36_s10 = int_to_ptr.vmem [resolvable:$true] %s35_s10  ;;  %s24_s12 = int_to_ptr.vmem [resolvable:$true] %s23_s12 }
   0x5   :  { %s733_s13 = scalar_lea.vmem %s36_s10, 1024  ;;  %p738_p1 = scmp.lt.s32.totalorder %s36_s10, %s36_s10 }
   0x6   :  { %p734_p0 = scmp.ne.s32.totalorder %s36_s10, %s733_s13  ;;  %p739_p2 = scmp.lt.s32.totalorder %s733_s13, %s733_s13 }
   0x8   :  { %p740_p3 = por %p739_p2, %p738_p1 }
   0xa   :  { %p741_p4 = pnand %p740_p3, %p734_p0 }
   0xc   :  { %744 = shalt.err (!%p741_p4)
}
   0xd   :  { %s835_s14 = smov 64   ;;  %s836_s15 = smov 4  }
   0xe   :  { %41 = dma.hbm_to_vmem [thread:$0]  %s967_s1, 1024, %s36_s10, [#allocation6], %s835_s14, %s835_s14, %s836_s15  }
   0xf   :  { %s753_s18 = scalar_lea.vmem %s24_s12, 128  ;;  %p758_p6 = scmp.lt.s32.totalorder %s24_s12, %s24_s12 }
  0x10   :  { %p754_p5 = scmp.ne.s32.totalorder %s24_s12, %s753_s18  ;;  %p759_p7 = scmp.lt.s32.totalorder %s753_s18, %s753_s18 }
  0x12   :  { %p760_p8 = por %p759_p7, %p758_p6 }
  0x14   :  { %p761_p9 = pnand %p760_p8, %p754_p5 }
  0x16   :  { %764 = shalt.err (!%p761_p9)
}
  0x17   :  { %29 = dma.hbm_to_vmem [thread:$0]  %s966_s0, 128, %s24_s12, [#allocation3], %s835_s14, %s835_s14, %s836_s15  }
  0x18   :  { %s837_s21 = smov [#allocation7]   ;;  %s838_s23 = smov [#allocation8]  }
  0x19   :  { %s51_s22 = sshll.u32 %s837_s21, 4  ;;  %s67_s24 = sshll.u32 %s838_s23, 4  ;;  %s52_s22 = int_to_ptr.vmem [resolvable:$true] %s51_s22  ;;  %s68_s24 = int_to_ptr.vmem [resolvable:$true] %s67_s24 }
  0x1a   :  { %s773_s1 = scalar_lea.vmem %s52_s22, 1024  ;;  %p778_p11 = scmp.lt.s32.totalorder %s52_s22, %s52_s22 }
  0x1b   :  { %p774_p10 = scmp.ne.s32.totalorder %s52_s22, %s773_s1  ;;  %p779_p12 = scmp.lt.s32.totalorder %s773_s1, %s773_s1 }
  0x1d   :  { %p780_p13 = por %p779_p12, %p778_p11 }
  0x1f   :  { %p781_p0 = pnand %p780_p13, %p774_p10 }
  0x21   :  { %784 = shalt.err (!%p781_p0)
}
  0x22   :  { %57 = dma.hbm_to_vmem [thread:$0]  %s970_s4, 1024, %s52_s22, [#allocation6], %s835_s14, %s835_s14, %s836_s15  }
  0x23   :  { %s793_s0 = scalar_lea.vmem %s68_s24, 1024  ;;  %p798_p2 = scmp.lt.s32.totalorder %s68_s24, %s68_s24 }
  0x24   :  { %p794_p1 = scmp.ne.s32.totalorder %s68_s24, %s793_s0  ;;  %p799_p3 = scmp.lt.s32.totalorder %s793_s0, %s793_s0 }
  0x26   :  { %p800_p4 = por %p799_p3, %p798_p2 }
  0x28   :  { %p801_p5 = pnand %p800_p4, %p794_p1 }
  0x2a   :  { %804 = shalt.err (!%p801_p5)
}
  0x2b   :  { %73 = dma.hbm_to_vmem [thread:$0]  %s973_s7, 1024, %s68_s24, [#allocation9], %s835_s14, %s835_s14, %s836_s15  }
  0x2c   :  { %825 = dma.done.wait [#allocation3], 128  }
  0x2d   :  { %826 = vsyncadd [#allocation3], 4294967168 }
  0x2e   :  { %827 = dma.done.wait [#allocation6], 2048  }
  0x2f   :  { %828 = vsyncadd [#allocation6], 4294965248 }
  0x30   :  { %829 = dma.done.wait [#allocation9], 1024  }
  0x31   :  { %830 = vsyncadd [#allocation9], 4294966272  ;;  %v839_v0 = vmov 0.0   ;;  %vm840_vm0 = vmmov 0   ;;  %v680_v1 = vld [vmem:[#allocation5 + $0x38] sm:$0xff]   ;;  %v681_v2 = vld [vmem:[#allocation5 + $0x30] sm:$0xff]  }
  0x32   :  { %609 = vmatprep.subr.bf16.mxu0 %v839_v0  ;;  %625 = vmatprep.mubr.msk.bf16.mxu0 %vm840_vm0, %v839_v0  ;;  %v682_v3 = vld [vmem:[#allocation5 + $0x28] sm:$0xff]   ;;  %v683_v4 = vld [vmem:[#allocation5 + $0x20] sm:$0xff]   ;;  %v684_v5 = vld [vmem:[#allocation5 + $0x18] sm:$0xff]   ;;  %s841_s12 = smov [#allocation10]  }
  0x33   :  { %629 = vmatprep.subr.bf16.mxu1 %v839_v0  ;;  %645 = vmatprep.mubr.msk.bf16.mxu1 %vm840_vm0, %v839_v0  ;;  %v685_v6 = vld [vmem:[#allocation5 + $0x10] sm:$0xff]   ;;  %v686_v7 = vld [vmem:[#allocation5 + $0x8] sm:$0xff]   ;;  %v687_v8 = vld [vmem:[#allocation5] sm:$0xff]   ;;  %s538_s13 = sshll.u32 %s841_s12, 4  ;;  %s539_s13 = int_to_ptr.vmem [resolvable:$true] %s538_s13 }
  0x34   :  { %610 = vmatpush3.bf16.msra.mxu0 %v680_v1  ;;  %v688_v9 = vld [vmem:[#allocation2] sm:$0xff]   ;;  %v690_v17 = vld [vmem:[#allocation7 + $0x30] sm:$0xff]   ;;  %v691_v18 = vld [vmem:[#allocation7 + $0x28] sm:$0xff]   ;;  %s805_s14 = scalar_lea.vmem %s539_s13, 256  ;;  %p810_p7 = scmp.lt.s32.totalorder %s539_s13, %s539_s13 }
  0x35   :  { %611 = vmatprep.subr.bf16.mxu0 %v839_v0  ;;  %v689_v16 = vld [vmem:[#allocation7 + $0x38] sm:$0xff]   ;;  %v692_v19 = vld [vmem:[#allocation7 + $0x20] sm:$0xff]   ;;  %v694_v21 = vld [vmem:[#allocation7 + $0x10] sm:$0xff]   ;;  %p806_p6 = scmp.ne.s32.totalorder %s539_s13, %s805_s14  ;;  %p811_p8 = scmp.lt.s32.totalorder %s805_s14, %s805_s14 }
  0x36   :  { %630 = vmatpush3.bf16.msra.mxu1 %v689_v16  ;;  %v693_v20 = vld [vmem:[#allocation7 + $0x18] sm:$0xff]   ;;  %v695_v22 = vld [vmem:[#allocation7 + $0x8] sm:$0xff]   ;;  %v696_v23 = vld [vmem:[#allocation7] sm:$0xff]  }
  0x37   :  { %631 = vmatprep.subr.bf16.mxu1 %v839_v0  ;;  %v561_v42 = vld [vmem:[%s968_s2] ss:$0 sm:$0xff]  ;;  %p812_p9 = por %p811_p8, %p810_p7 }
  0x38   :  { %612 = vmatpush3.bf16.msra.mxu0 %v681_v2  ;;  %v562_v44 = vld [vmem:[%s969_s3] ss:$0 sm:$0xff] }
  0x39   :  { %613 = vmatprep.subr.bf16.mxu0 %v839_v0  ;;  %p813_p10 = pnand %p812_p9, %p806_p6 }
  0x3a   :  { %632 = vmatpush3.bf16.msra.mxu1 %v690_v17 }
  0x3b   :  { %633 = vmatprep.subr.bf16.mxu1 %v839_v0 }
  0x3c   :  { %614 = vmatpush3.bf16.msra.mxu0 %v682_v3 }
  0x3d   :  { %615 = vmatprep.subr.bf16.mxu0 %v839_v0 }
  0x3e   :  { %634 = vmatpush3.bf16.msra.mxu1 %v691_v18 }
  0x3f   :  { %635 = vmatprep.subr.bf16.mxu1 %v839_v0 }
  0x40   :  { %616 = vmatpush3.bf16.msra.mxu0 %v683_v4  ;;  %v697_v4 = vld [vmem:[#allocation8 + $0x38] sm:$0xff]  }
  0x41   :  { %617 = vmatprep.subr.bf16.mxu0 %v839_v0 }
  0x42   :  { %636 = vmatpush3.bf16.msra.mxu1 %v692_v19 }
  0x43   :  { %637 = vmatprep.subr.bf16.mxu1 %v839_v0 }
  0x44   :  { %618 = vmatpush3.bf16.msra.mxu0 %v684_v5  ;;  %v698_v5 = vld [vmem:[#allocation8 + $0x30] sm:$0xff]  }
  0x45   :  { %619 = vmatprep.subr.bf16.mxu0 %v839_v0 }
  0x46   :  { %638 = vmatpush3.bf16.msra.mxu1 %v693_v20 }
  0x47   :  { %639 = vmatprep.subr.bf16.mxu1 %v839_v0 }
  0x48   :  { %620 = vmatpush3.bf16.msra.mxu0 %v685_v6  ;;  %v699_v6 = vld [vmem:[#allocation8 + $0x28] sm:$0xff]  }
  0x49   :  { %621 = vmatprep.subr.bf16.mxu0 %v839_v0 }
  0x4a   :  { %640 = vmatpush3.bf16.msra.mxu1 %v694_v21 }
  0x4b   :  { %641 = vmatprep.subr.bf16.mxu1 %v839_v0 }
  0x4c   :  { %622 = vmatpush3.bf16.msra.mxu0 %v686_v7  ;;  %v700_v7 = vld [vmem:[#allocation8 + $0x20] sm:$0xff]  }
  0x4d   :  { %623 = vmatprep.subr.bf16.mxu0 %v839_v0 }
  0x4e   :  { %642 = vmatpush3.bf16.msra.mxu1 %v695_v22 }
  0x4f   :  { %643 = vmatprep.subr.bf16.mxu1 %v839_v0 }
  0x50   :  { %624 = vmatpush3.bf16.msra.mxu0 %v687_v8  ;;  %v701_v8 = vld [vmem:[#allocation8 + $0x18] sm:$0xff]  }
  0x51   :  { %649 = vmatprep.subr.bf16.mxu0 %v839_v0 }
  0x52   :  { %644 = vmatpush3.bf16.msra.mxu1 %v696_v23 }
  0x53   :  { %626 = vmatmul.mubr.bf16.vlgmr.msra.gmra.mxu0 %v688_v9  ;;  %v702_v9 = vld [vmem:[#allocation8 + $0x10] sm:$0xff]  }
  0x54   :  { %665 = vmatprep.mubr.msk.bf16.mxu0 %vm840_vm0, %v839_v0  ;;  %650 = vmatpush3.bf16.msra.mxu0 %v697_v4 }
  0x55   :  { %651 = vmatprep.subr.bf16.mxu0 %v839_v0 }
  0x58   :  { %652 = vmatpush3.bf16.msra.mxu0 %v698_v5 }
  0x59   :  { %653 = vmatprep.subr.bf16.mxu0 %v839_v0 }
  0x5c   :  { %654 = vmatpush3.bf16.msra.mxu0 %v699_v6 }
  0x5d   :  { %655 = vmatprep.subr.bf16.mxu0 %v839_v0 }
  0x60   :  { %656 = vmatpush3.bf16.msra.mxu0 %v700_v7 }
  0x61   :  { %657 = vmatprep.subr.bf16.mxu0 %v839_v0 }
  0x64   :  { %658 = vmatpush3.bf16.msra.mxu0 %v701_v8 }
  0x65   :  { %659 = vmatprep.subr.bf16.mxu0 %v839_v0 }
  0x68   :  { %660 = vmatpush3.bf16.msra.mxu0 %v702_v9 }
  0x69   :  { %661 = vmatprep.subr.bf16.mxu0 %v839_v0 }
 0x113   :  { %v195_v10 = vpop.f32.mrf.mxu0 }
 0x114   :  { %204 = vadd.xlane.f32.xlu0 %v195_v10  ;;  %v208_v11 = vmul.f32 %v195_v10, %v195_v10 }
 0x115   :  { %v627_v12 = vpop.f32.mrf.mxu0 }
 0x116   :  { %210 = vadd.xlane.f32.xlu1 %v208_v11  ;;  %v704_v11 = vld [vmem:[#allocation8] sm:$0xff]  }
 0x117   :  { %v198_v13 = vpop.f32.mrf.mxu0 }
 0x118   :  { %206 = vadd.xlane.f32.xlu0 %v198_v13  ;;  %v209_v14 = vmul.f32 %v198_v13, %v198_v13 }
 0x119   :  { %v628_v15 = vpop.f32.mrf.mxu0 }
 0x11a   :  { %212 = vadd.xlane.f32.xlu1 %v209_v14 }
 0x19d   :  { %v205_v24 = vpop.xlane.xlu0 %204 }
 0x19e   :  { %v214_v25 = vmul.f32 0.03125, %v205_v24 }
 0x19f   :  { %v211_v26 = vpop.xlane.xlu1 %210 }
 0x1a0   :  { %v218_v27 = vmul.f32 %v214_v25, %v214_v25  ;;  %v216_v28 = vmul.f32 0.03125, %v211_v26  ;;  %v224_v40 = vsub.f32 %v195_v10, %v214_v25  ;;  %v703_v10 = vld [vmem:[#allocation8 + $0x8] sm:$0xff]  }
 0x1a1   :  { %v207_v29 = vpop.xlane.xlu0 %206  ;;  %662 = vmatpush3.bf16.msra.mxu0 %v703_v10 }
 0x1a2   :  { %v220_v30 = vsub.f32 %v216_v28, %v218_v27  ;;  %v215_v31 = vmul.f32 0.03125, %v207_v29  ;;  %663 = vmatprep.subr.bf16.mxu0 %v839_v0  ;;  %v571_v29 = vld [vmem:[%s971_s5] ss:$0 sm:$0xff] }
 0x1a3   :  { %v213_v32 = vpop.xlane.xlu1 %212 }
 0x1a4   :  { %v222_v33 = vmax.f32 %v220_v30, 0.0  ;;  %v219_v34 = vmul.f32 %v215_v31, %v215_v31  ;;  %v217_v35 = vmul.f32 0.03125, %v213_v32  ;;  %v225_v45 = vsub.f32 %v198_v13, %v215_v31  ;;  %v572_v31 = vld [vmem:[%s972_s6] ss:$0 sm:$0xff] }
 0x1a5   :  { %664 = vmatpush3.bf16.msra.mxu0 %v704_v11 }
 0x1a6   :  { %v226_v36 = vadd.f32 0.001, %v222_v33  ;;  %v221_v37 = vsub.f32 %v217_v35, %v219_v34 }
 0x1a8   :  { %705 = vrsqrt.f32 %v226_v36  ;;  %v223_v38 = vmax.f32 %v221_v37, 0.0 }
 0x1aa   :  { %v227_v39 = vadd.f32 0.001, %v223_v38 }
 0x1ac   :  { %707 = vrsqrt.f32 %v227_v39 }
 0x1b5   :  { %v706_v41 = vpop.eup %705 }
 0x1b6   :  { %v230_v43 = vmul.f32 %v706_v41, %v224_v40 }
 0x1b8   :  { %v238_v46 = vmul.f32 %v561_v42, %v230_v43 }
 0x1b9   :  { %v708_v47 = vpop.eup %707 }
 0x1ba   :  { %v231_v48 = vmul.f32 %v708_v47, %v225_v45  ;;  %v246_v49 = vadd.f32 %v562_v44, %v238_v46 }
 0x1bc   :  { %v239_v50 = vmul.f32 %v561_v42, %v231_v48  ;;  %v248_v51 = vmul.f32 0.5, %v246_v49  ;;  %v573_v48 = vld [vmem:[%s974_s8] ss:$0 sm:$0xff] }
 0x1be   :  { %v247_v52 = vadd.f32 %v562_v44, %v239_v50  ;;  %709 = vtanh.f32 %v248_v51 }
 0x1c0   :  { %v249_v53 = vmul.f32 0.5, %v247_v52 }
 0x1c2   :  { %711 = vtanh.f32 %v249_v53 }
 0x1cb   :  { %v710_v54 = vpop.eup %709 }
 0x1cc   :  { %v252_v55 = vadd.f32 1.0, %v710_v54 }
 0x1ce   :  { %v254_v58 = vmul.f32 %v252_v55, %v248_v51 }
 0x1cf   :  { %v712_v56 = vpop.eup %711 }
 0x1d0   :  { %v253_v57 = vadd.f32 1.0, %v712_v56 }
 0x1d2   :  { %v255_v59 = vmul.f32 %v253_v57, %v249_v53 }
 0x1d4   :  { %v256_v60 = vpack.c.bf16 %v255_v59, %v254_v58 }
 0x1d6   :  { %646 = vmatmul.mubr.bf16.vlgmr.msra.gmra.mxu1 %v256_v60 }
 0x296   :  { %v355_v61 = vpop.f32.mrf.mxu1 }
 0x297   :  { %364 = vadd.xlane.f32.xlu0 %v355_v61  ;;  %v368_v63 = vmul.f32 %v355_v61, %v355_v61 }
 0x298   :  { %v647_v62 = vpop.f32.mrf.mxu1 }
 0x29a   :  { %v358_v1 = vpop.f32.mrf.mxu1 }
 0x29b   :  { %370 = vadd.xlane.f32.xlu0 %v368_v63  ;;  %366 = vadd.xlane.f32.xlu1 %v358_v1  ;;  %v369_v3 = vmul.f32 %v358_v1, %v358_v1 }
 0x29c   :  { %v648_v2 = vpop.f32.mrf.mxu1 }
 0x29f   :  { %372 = vadd.xlane.f32.xlu1 %v369_v3 }
 0x320   :  { %v365_v12 = vpop.xlane.xlu0 %364 }
 0x321   :  { %v374_v13 = vmul.f32 0.03125, %v365_v12 }
 0x323   :  { %v378_v16 = vmul.f32 %v374_v13, %v374_v13  ;;  %v384_v0 = vsub.f32 %v355_v61, %v374_v13 }
 0x324   :  { %v371_v14 = vpop.xlane.xlu0 %370  ;;  %v367_v15 = vpop.xlane.xlu1 %366 }
 0x325   :  { %v376_v17 = vmul.f32 0.03125, %v371_v14  ;;  %v375_v18 = vmul.f32 0.03125, %v367_v15 }
 0x327   :  { %v380_v19 = vsub.f32 %v376_v17, %v378_v16  ;;  %v379_v22 = vmul.f32 %v375_v18, %v375_v18  ;;  %v385_v32 = vsub.f32 %v358_v1, %v375_v18 }
 0x328   :  { %v373_v20 = vpop.xlane.xlu1 %372 }
 0x329   :  { %v382_v21 = vmax.f32 %v380_v19, 0.0  ;;  %v377_v23 = vmul.f32 0.03125, %v373_v20 }
 0x32b   :  { %v386_v24 = vadd.f32 0.001, %v382_v21  ;;  %v381_v25 = vsub.f32 %v377_v23, %v379_v22 }
 0x32d   :  { %713 = vrsqrt.f32 %v386_v24  ;;  %v383_v26 = vmax.f32 %v381_v25, 0.0 }
 0x32f   :  { %v387_v27 = vadd.f32 0.001, %v383_v26 }
 0x331   :  { %715 = vrsqrt.f32 %v387_v27 }
 0x33a   :  { %v714_v28 = vpop.eup %713 }
 0x33b   :  { %v390_v30 = vmul.f32 %v714_v28, %v384_v0 }
 0x33d   :  { %v398_v33 = vmul.f32 %v571_v29, %v390_v30 }
 0x33e   :  { %v716_v34 = vpop.eup %715 }
 0x33f   :  { %v391_v35 = vmul.f32 %v716_v34, %v385_v32  ;;  %v406_v36 = vadd.f32 %v572_v31, %v398_v33 }
 0x341   :  { %v399_v37 = vmul.f32 %v571_v29, %v391_v35  ;;  %v408_v38 = vmul.f32 0.5, %v406_v36 }
 0x343   :  { %v407_v39 = vadd.f32 %v572_v31, %v399_v37  ;;  %717 = vtanh.f32 %v408_v38 }
 0x345   :  { %v409_v40 = vmul.f32 0.5, %v407_v39 }
 0x347   :  { %719 = vtanh.f32 %v409_v40 }
 0x350   :  { %v718_v41 = vpop.eup %717 }
 0x351   :  { %v412_v42 = vadd.f32 1.0, %v718_v41 }
 0x353   :  { %v414_v45 = vmul.f32 %v412_v42, %v408_v38 }
 0x354   :  { %v720_v43 = vpop.eup %719 }
 0x355   :  { %v413_v44 = vadd.f32 1.0, %v720_v43 }
 0x357   :  { %v415_v46 = vmul.f32 %v413_v44, %v409_v40 }
 0x359   :  { %v416_v47 = vpack.c.bf16 %v415_v46, %v414_v45 }
 0x35b   :  { %666 = vmatmul.mubr.bf16.vlgmr.msra.gmra.mxu0 %v416_v47 }
 0x41b   :  { %v522_v49 = vpop.f32.mrf.mxu0 }
 0x41c   :  { %v523_v50 = vadd.f32 %v573_v48, %v522_v49 }
 0x41d   :  { %v667_v51 = vpop.f32.mrf.mxu0 }
 0x41e   :  { %721 = vtanh.f32 %v523_v50 }
 0x41f   :  { %v525_v52 = vpop.f32.mrf.mxu0 }
 0x420   :  { %v526_v53 = vadd.f32 %v573_v48, %v525_v52 }
 0x421   :  { %v668_v54 = vpop.f32.mrf.mxu0 }
 0x422   :  { %723 = vtanh.f32 %v526_v53 }
 0x42b   :  { %v722_v55 = vpop.eup %721 }
 0x42c   :  { %531 = vst [vmem:[#allocation10] sm:$0xff] %v722_v55 }
 0x42f   :  { %v724_v56 = vpop.eup %723 }
 0x430   :  { %532 = vst [vmem:[#allocation10 + $0x8] sm:$0xff] %v724_v56 }
 0x431   :  { %816 = shalt.err (!%p813_p10)
}
 0x432   :  { %s842_s8 = smov 128   ;;  %s843_s15 = smov 8  }
 0x433   :  { %544 = dma.vmem_to_hbm [thread:$0]  %s539_s13, 256, %s975_s9, [#allocation4], %s842_s8, %s842_s8, %s843_s15  }
 0x434   :  { %831 = dma.done.wait [#allocation4], 256  }
 0x435   :  { %832 = vsyncadd [#allocation4], 4294967040 }
 0x436   :  { %548 = vsyncpa [#allocation3], 1 }
 0x437   :  { %549 = vsyncpa [#allocation6], 1 }
 0x438   :  { %550 = vsyncpa [#allocation9], 1 }
 0x439   :  { %551 = vsyncpa [#allocation4], 1 }

// kernel: tpu_custom_call.1
= control target key start
LH: loop header
LB: loop body
LE: loop exit
PB: predicated region body
PF: predicated region fallthrough
CT: control target
= control target key end

     0   :  { %14 = vsyncpa [#allocation3], 0  ;;  %s966_s0 = inlined_call_operand.hbm [shape: bf16[16,128], index: 0, kind: input, shape index: {}]   ;;  %s967_s1 = inlined_call_operand.hbm [shape: bf16[128,128], index: 1, kind: input, shape index: {}]   ;;  %s968_s2 = inlined_call_operand.vmem [shape: f32[1,128], index: 2, kind: input, shape index: {}]   ;;  %s969_s3 = inlined_call_operand.vmem [shape: f32[1,128], index: 3, kind: input, shape index: {}]   ;;  %s970_s4 = inlined_call_operand.hbm [shape: bf16[128,128], index: 4, kind: input, shape index: {}]   ;;  %s971_s5 = inlined_call_operand.vmem [shape: f32[1,128], index: 5, kind: input, shape index: {}]   ;;  %s972_s6 = inlined_call_operand.vmem [shape: f32[1,128], index: 6, kind: input, shape index: {}]   ;;  %s973_s7 = inlined_call_operand.hbm [shape: bf16[128,128], index: 7, kind: input, shape index: {}]   ;;  %s974_s8 = inlined_call_operand.vmem [shape: f32[1,128], index: 8, kind: input, shape index: {}]   ;;  %s975_s9 = inlined_call_operand.hbm [shape: f32[16,128], index: 9, kind: output, shape index: {}]  }
   0x1   :  { %15 = vsyncpa [#allocation6], 0 }
   0x2   :  { %16 = vsyncpa [#allocation9], 0 }
   0x3   :  { %17 = vsyncpa [#allocation4], 0  ;;  %s833_s30 = smov [#allocation5]   ;;  %s834_s11 = smov [#allocation2]  }
   0x4   :  { %s35_s10 = sshll.u32 %s833_s30, 4  ;;  %s23_s12 = sshll.u32 %s834_s11, 4  ;;  %s36_s10 = int_to_ptr.vmem [resolvable:$true] %s35_s10  ;;  %s24_s12 = int_to_ptr.vmem [resolvable:$true] %s23_s12 }
   0x5   :  { %s733_s13 = scalar_lea.vmem %s36_s10, 1024  ;;  %p738_p1 = scmp.lt.s32.totalorder %s36_s10, %s36_s10 }
   0x6   :  { %p734_p0 = scmp.ne.s32.totalorder %s36_s10, %s733_s13  ;;  %p739_p2 = scmp.lt.s32.totalorder %s733_s13, %s733_s13 }
   0x8   :  { %p740_p3 = por %p739_p2, %p738_p1 }
   0xa   :  { %p741_p4 = pnand %p740_p3, %p734_p0 }
   0xc   :  { %744 = shalt.err (!%p741_p4)
}
   0xd   :  { %s835_s14 = smov 64   ;;  %s836_s15 = smov 4  }
   0xe   :  { %41 = dma.hbm_to_vmem [thread:$0]  %s967_s1, 1024, %s36_s10, [#allocation6], %s835_s14, %s835_s14, %s836_s15  }
   0xf   :  { %s753_s18 = scalar_lea.vmem %s24_s12, 128  ;;  %p758_p6 = scmp.lt.s32.totalorder %s24_s12, %s24_s12 }
  0x10   :  { %p754_p5 = scmp.ne.s32.totalorder %s24_s12, %s753_s18  ;;  %p759_p7 = scmp.lt.s32.totalorder %s753_s18, %s753_s18 }
  0x12   :  { %p760_p8 = por %p759_p7, %p758_p6 }
  0x14   :  { %p761_p9 = pnand %p760_p8, %p754_p5 }
  0x16   :  { %764 = shalt.err (!%p761_p9)
}
  0x17   :  { %29 = dma.hbm_to_vmem [thread:$0]  %s966_s0, 128, %s24_s12, [#allocation3], %s835_s14, %s835_s14, %s836_s15  }
  0x18   :  { %s837_s21 = smov [#allocation7]   ;;  %s838_s23 = smov [#allocation8]  }
  0x19   :  { %s51_s22 = sshll.u32 %s837_s21, 4  ;;  %s67_s24 = sshll.u32 %s838_s23, 4  ;;  %s52_s22 = int_to_ptr.vmem [resolvable:$true] %s51_s22  ;;  %s68_s24 = int_to_ptr.vmem [resolvable:$true] %s67_s24 }
  0x1a   :  { %s773_s1 = scalar_lea.vmem %s52_s22, 1024  ;;  %p778_p11 = scmp.lt.s32.totalorder %s52_s22, %s52_s22 }
  0x1b   :  { %p774_p10 = scmp.ne.s32.totalorder %s52_s22, %s773_s1  ;;  %p779_p12 = scmp.lt.s32.totalorder %s773_s1, %s773_s1 }
  0x1d   :  { %p780_p13 = por %p779_p12, %p778_p11 }
  0x1f   :  { %p781_p0 = pnand %p780_p13, %p774_p10 }
  0x21   :  { %784 = shalt.err (!%p781_p0)
}
  0x22   :  { %57 = dma.hbm_to_vmem [thread:$0]  %s970_s4, 1024, %s52_s22, [#allocation6], %s835_s14, %s835_s14, %s836_s15  }
  0x23   :  { %s793_s0 = scalar_lea.vmem %s68_s24, 1024  ;;  %p798_p2 = scmp.lt.s32.totalorder %s68_s24, %s68_s24 }
  0x24   :  { %p794_p1 = scmp.ne.s32.totalorder %s68_s24, %s793_s0  ;;  %p799_p3 = scmp.lt.s32.totalorder %s793_s0, %s793_s0 }
  0x26   :  { %p800_p4 = por %p799_p3, %p798_p2 }
  0x28   :  { %p801_p5 = pnand %p800_p4, %p794_p1 }
  0x2a   :  { %804 = shalt.err (!%p801_p5)
}
  0x2b   :  { %73 = dma.hbm_to_vmem [thread:$0]  %s973_s7, 1024, %s68_s24, [#allocation9], %s835_s14, %s835_s14, %s836_s15  }
  0x2c   :  { %825 = dma.done.wait [#allocation3], 128  }
  0x2d   :  { %826 = vsyncadd [#allocation3], 4294967168 }
  0x2e   :  { %827 = dma.done.wait [#allocation6], 2048  }
  0x2f   :  { %828 = vsyncadd [#allocation6], 4294965248 }
  0x30   :  { %829 = dma.done.wait [#allocation9], 1024  }
  0x31   :  { %830 = vsyncadd [#allocation9], 4294966272  ;;  %v839_v0 = vmov 0.0   ;;  %vm840_vm0 = vmmov 0   ;;  %v680_v1 = vld [vmem:[#allocation5 + $0x38] sm:$0xff]   ;;  %v681_v2 = vld [vmem:[#allocation5 + $0x30] sm:$0xff]  }
  0x32   :  { %609 = vmatprep.subr.bf16.mxu0 %v839_v0  ;;  %625 = vmatprep.mubr.msk.bf16.mxu0 %vm840_vm0, %v839_v0  ;;  %v682_v3 = vld [vmem:[#allocation5 + $0x28] sm:$0xff]   ;;  %v683_v4 = vld [vmem:[#allocation5 + $0x20] sm:$0xff]   ;;  %v684_v5 = vld [vmem:[#allocation5 + $0x18] sm:$0xff]   ;;  %s841_s12 = smov [#allocation10]  }
  0x33   :  { %629 = vmatprep.subr.bf16.mxu1 %v839_v0  ;;  %645 = vmatprep.mubr.msk.bf16.mxu1 %vm840_vm0, %v839_v0  ;;  %v685_v6 = vld [vmem:[#allocation5 + $0x10] sm:$0xff]   ;;  %v686_v7 = vld [vmem:[#allocation5 + $0x8] sm:$0xff]   ;;  %v687_v8 = vld [vmem:[#allocation5] sm:$0xff]   ;;  %s538_s13 = sshll.u32 %s841_s12, 4  ;;  %s539_s13 = int_to_ptr.vmem [resolvable:$true] %s538_s13 }
  0x34   :  { %610 = vmatpush3.bf16.msra.mxu0 %v680_v1  ;;  %v688_v9 = vld [vmem:[#allocation2] sm:$0xff]   ;;  %v690_v17 = vld [vmem:[#allocation7 + $0x30] sm:$0xff]   ;;  %v691_v18 = vld [vmem:[#allocation7 + $0x28] sm:$0xff]   ;;  %s805_s14 = scalar_lea.vmem %s539_s13, 256  ;;  %p810_p7 = scmp.lt.s32.totalorder %s539_s13, %s539_s13 }
  0x35   :  { %611 = vmatprep.subr.bf16.mxu0 %v839_v0  ;;  %v689_v16 = vld [vmem:[#allocation7 + $0x38] sm:$0xff]   ;;  %v692_v19 = vld [vmem:[#allocation7 + $0x20] sm:$0xff]   ;;  %v694_v21 = vld [vmem:[#allocation7 + $0x10] sm:$0xff]   ;;  %p806_p6 = scmp.ne.s32.totalorder %s539_s13, %s805_s14  ;;  %p811_p8 = scmp.lt.s32.totalorder %s805_s14, %s805_s14 }
  0x36   :  { %630 = vmatpush3.bf16.msra.mxu1 %v689_v16  ;;  %v693_v20 = vld [vmem:[#allocation7 + $0x18] sm:$0xff]   ;;  %v695_v22 = vld [vmem:[#allocation7 + $0x8] sm:$0xff]   ;;  %v696_v23 = vld [vmem:[#allocation7] sm:$0xff]  }
  0x37   :  { %631 = vmatprep.subr.bf16.mxu1 %v839_v0  ;;  %v561_v42 = vld [vmem:[%s968_s2] ss:$0 sm:$0xff]  ;;  %p812_p9 = por %p811_p8, %p810_p7 }
  0x38   :  { %612 = vmatpush3.bf16.msra.mxu0 %v681_v2  ;;  %v562_v44 = vld [vmem:[%s969_s3] ss:$0 sm:$0xff] }
  0x39   :  { %613 = vmatprep.subr.bf16.mxu0 %v839_v0  ;;  %p813_p10 = pnand %p812_p9, %p806_p6 }
  0x3a   :  { %632 = vmatpush3.bf16.msra.mxu1 %v690_v17 }
  0x3b   :  { %633 = vmatprep.subr.bf16.mxu1 %v839_v0 }
  0x3c   :  { %614 = vmatpush3.bf16.msra.mxu0 %v682_v3 }
  0x3d   :  { %615 = vmatprep.subr.bf16.mxu0 %v839_v0 }
  0x3e   :  { %634 = vmatpush3.bf16.msra.mxu1 %v691_v18 }
  0x3f   :  { %635 = vmatprep.subr.bf16.mxu1 %v839_v0 }
  0x40   :  { %616 = vmatpush3.bf16.msra.mxu0 %v683_v4  ;;  %v697_v4 = vld [vmem:[#allocation8 + $0x38] sm:$0xff]  }
  0x41   :  { %617 = vmatprep.subr.bf16.mxu0 %v839_v0 }
  0x42   :  { %636 = vmatpush3.bf16.msra.mxu1 %v692_v19 }
  0x43   :  { %637 = vmatprep.subr.bf16.mxu1 %v839_v0 }
  0x44   :  { %618 = vmatpush3.bf16.msra.mxu0 %v684_v5  ;;  %v698_v5 = vld [vmem:[#allocation8 + $0x30] sm:$0xff]  }
  0x45   :  { %619 = vmatprep.subr.bf16.mxu0 %v839_v0 }
  0x46   :  { %638 = vmatpush3.bf16.msra.mxu1 %v693_v20 }
  0x47   :  { %639 = vmatprep.subr.bf16.mxu1 %v839_v0 }
  0x48   :  { %620 = vmatpush3.bf16.msra.mxu0 %v685_v6  ;;  %v699_v6 = vld [vmem:[#allocation8 + $0x28] sm:$0xff]  }
  0x49   :  { %621 = vmatprep.subr.bf16.mxu0 %v839_v0 }
  0x4a   :  { %640 = vmatpush3.bf16.msra.mxu1 %v694_v21 }
  0x4b   :  { %641 = vmatprep.subr.bf16.mxu1 %v839_v0 }
  0x4c   :  { %622 = vmatpush3.bf16.msra.mxu0 %v686_v7  ;;  %v700_v7 = vld [vmem:[#allocation8 + $0x20] sm:$0xff]  }
  0x4d   :  { %623 = vmatprep.subr.bf16.mxu0 %v839_v0 }
  0x4e   :  { %642 = vmatpush3.bf16.msra.mxu1 %v695_v22 }
  0x4f   :  { %643 = vmatprep.subr.bf16.mxu1 %v839_v0 }
  0x50   :  { %624 = vmatpush3.bf16.msra.mxu0 %v687_v8  ;;  %v701_v8 = vld [vmem:[#allocation8 + $0x18] sm:$0xff]  }
  0x51   :  { %649 = vmatprep.subr.bf16.mxu0 %v839_v0 }
  0x52   :  { %644 = vmatpush3.bf16.msra.mxu1 %v696_v23 }
  0x53   :  { %626 = vmatmul.mubr.bf16.vlgmr.msra.gmra.mxu0 %v688_v9  ;;  %v702_v9 = vld [vmem:[#allocation8 + $0x10] sm:$0xff]  }
  0x54   :  { %665 = vmatprep.mubr.msk.bf16.mxu0 %vm840_vm0, %v839_v0  ;;  %650 = vmatpush3.bf16.msra.mxu0 %v697_v4 }
  0x55   :  { %651 = vmatprep.subr.bf16.mxu0 %v839_v0 }
  0x58   :  { %652 = vmatpush3.bf16.msra.mxu0 %v698_v5 }
  0x59   :  { %653 = vmatprep.subr.bf16.mxu0 %v839_v0 }
  0x5c   :  { %654 = vmatpush3.bf16.msra.mxu0 %v699_v6 }
  0x5d   :  { %655 = vmatprep.subr.bf16.mxu0 %v839_v0 }
  0x60   :  { %656 = vmatpush3.bf16.msra.mxu0 %v700_v7 }
  0x61   :  { %657 = vmatprep.subr.bf16.mxu0 %v839_v0 }
  0x64   :  { %658 = vmatpush3.bf16.msra.mxu0 %v701_v8 }
  0x65   :  { %659 = vmatprep.subr.bf16.mxu0 %v839_v0 }
  0x68   :  { %660 = vmatpush3.bf16.msra.mxu0 %v702_v9 }
  0x69   :  { %661 = vmatprep.subr.bf16.mxu0 %v839_v0 }
 0x113   :  { %v195_v10 = vpop.f32.mrf.mxu0 }
 0x114   :  { %204 = vadd.xlane.f32.xlu0 %v195_v10  ;;  %v208_v11 = vmul.f32 %v195_v10, %v195_v10 }
 0x115   :  { %v627_v12 = vpop.f32.mrf.mxu0 }
 0x116   :  { %210 = vadd.xlane.f32.xlu1 %v208_v11  ;;  %v704_v11 = vld [vmem:[#allocation8] sm:$0xff]  }
 0x117   :  { %v198_v13 = vpop.f32.mrf.mxu0 }
 0x118   :  { %206 = vadd.xlane.f32.xlu0 %v198_v13  ;;  %v209_v14 = vmul.f32 %v198_v13, %v198_v13 }
 0x119   :  { %v628_v15 = vpop.f32.mrf.mxu0 }
 0x11a   :  { %212 = vadd.xlane.f32.xlu1 %v209_v14 }
 0x19d   :  { %v205_v24 = vpop.xlane.xlu0 %204 }
 0x19e   :  { %v214_v25 = vmul.f32 0.03125, %v205_v24 }
 0x19f   :  { %v211_v26 = vpop.xlane.xlu1 %210 }
 0x1a0   :  { %v218_v27 = vmul.f32 %v214_v25, %v214_v25  ;;  %v216_v28 = vmul.f32 0.03125, %v211_v26  ;;  %v224_v40 = vsub.f32 %v195_v10, %v214_v25  ;;  %v703_v10 = vld [vmem:[#allocation8 + $0x8] sm:$0xff]  }
 0x1a1   :  { %v207_v29 = vpop.xlane.xlu0 %206  ;;  %662 = vmatpush3.bf16.msra.mxu0 %v703_v10 }
 0x1a2   :  { %v220_v30 = vsub.f32 %v216_v28, %v218_v27  ;;  %v215_v31 = vmul.f32 0.03125, %v207_v29  ;;  %663 = vmatprep.subr.bf16.mxu0 %v839_v0  ;;  %v571_v29 = vld [vmem:[%s971_s5] ss:$0 sm:$0xff] }
 0x1a3   :  { %v213_v32 = vpop.xlane.xlu1 %212 }
 0x1a4   :  { %v222_v33 = vmax.f32 %v220_v30, 0.0  ;;  %v219_v34 = vmul.f32 %v215_v31, %v215_v31  ;;  %v217_v35 = vmul.f32 0.03125, %v213_v32  ;;  %v225_v45 = vsub.f32 %v198_v13, %v215_v31  ;;  %v572_v31 = vld [vmem:[%s972_s6] ss:$0 sm:$0xff] }
 0x1a5   :  { %664 = vmatpush3.bf16.msra.mxu0 %v704_v11 }
 0x1a6   :  { %v226_v36 = vadd.f32 0.001, %v222_v33  ;;  %v221_v37 = vsub.f32 %v217_v35, %v219_v34 }
 0x1a8   :  { %705 = vrsqrt.f32 %v226_v36  ;;  %v223_v38 = vmax.f32 %v221_v37, 0.0 }
 0x1aa   :  { %v227_v39 = vadd.f32 0.001, %v223_v38 }
 0x1ac   :  { %707 = vrsqrt.f32 %v227_v39 }
 0x1b5   :  { %v706_v41 = vpop.eup %705 }
 0x1b6   :  { %v230_v43 = vmul.f32 %v706_v41, %v224_v40 }
 0x1b8   :  { %v238_v46 = vmul.f32 %v561_v42, %v230_v43 }
 0x1b9   :  { %v708_v47 = vpop.eup %707 }
 0x1ba   :  { %v231_v48 = vmul.f32 %v708_v47, %v225_v45  ;;  %v246_v49 = vadd.f32 %v562_v44, %v238_v46 }
 0x1bc   :  { %v239_v50 = vmul.f32 %v561_v42, %v231_v48  ;;  %v248_v51 = vmul.f32 0.5, %v246_v49  ;;  %v573_v48 = vld [vmem:[%s974_s8] ss:$0 sm:$0xff] }
 0x1be   :  { %v247_v52 = vadd.f32 %v562_v44, %v239_v50  ;;  %709 = vtanh.f32 %v248_v51 }
 0x1c0   :  { %v249_v53 = vmul.f32 0.5, %v247_v52 }
 0x1c2   :  { %711 = vtanh.f32 %v249_v53 }
 0x1cb   :  { %v710_v54 = vpop.eup %709 }
 0x1cc   :  { %v252_v55 = vadd.f32 1.0, %v710_v54 }
 0x1ce   :  { %v254_v58 = vmul.f32 %v252_v55, %v248_v51 }
 0x1cf   :  { %v712_v56 = vpop.eup %711 }
 0x1d0   :  { %v253_v57 = vadd.f32 1.0, %v712_v56 }
 0x1d2   :  { %v255_v59 = vmul.f32 %v253_v57, %v249_v53 }
 0x1d4   :  { %v256_v60 = vpack.c.bf16 %v255_v59, %v254_v58 }
 0x1d6   :  { %646 = vmatmul.mubr.bf16.vlgmr.msra.gmra.mxu1 %v256_v60 }
 0x296   :  { %v355_v61 = vpop.f32.mrf.mxu1 }
 0x297   :  { %364 = vadd.xlane.f32.xlu0 %v355_v61  ;;  %v368_v63 = vmul.f32 %v355_v61, %v355_v61 }
 0x298   :  { %v647_v62 = vpop.f32.mrf.mxu1 }
 0x29a   :  { %v358_v1 = vpop.f32.mrf.mxu1 }
 0x29b   :  { %370 = vadd.xlane.f32.xlu0 %v368_v63  ;;  %366 = vadd.xlane.f32.xlu1 %v358_v1  ;;  %v369_v3 = vmul.f32 %v358_v1, %v358_v1 }
 0x29c   :  { %v648_v2 = vpop.f32.mrf.mxu1 }
 0x29f   :  { %372 = vadd.xlane.f32.xlu1 %v369_v3 }
 0x320   :  { %v365_v12 = vpop.xlane.xlu0 %364 }
 0x321   :  { %v374_v13 = vmul.f32 0.03125, %v365_v12 }
 0x323   :  { %v378_v16 = vmul.f32 %v374_v13, %v374_v13  ;;  %v384_v0 = vsub.f32 %v355_v61, %v374_v13 }
 0x324   :  { %v371_v14 = vpop.xlane.xlu0 %370  ;;  %v367_v15 = vpop.xlane.xlu1 %366 }
 0x325   :  { %v376_v17 = vmul.f32 0.03125, %v371_v14  ;;  %v375_v18 = vmul.f32 0.03125, %v367_v15 }
 0x327   :  { %v380_v19 = vsub.f32 %v376_v17, %v378_v16  ;;  %v379_v22 = vmul.f32 %v375_v18, %v375_v18  ;;  %v385_v32 = vsub.f32 %v358_v1, %v375_v18 }
 0x328   :  { %v373_v20 = vpop.xlane.xlu1 %372 }
 0x329   :  { %v382_v21 = vmax.f32 %v380_v19, 0.0  ;;  %v377_v23 = vmul.f32 0.03125, %v373_v20 }
 0x32b   :  { %v386_v24 = vadd.f32 0.001, %v382_v21  ;;  %v381_v25 = vsub.f32 %v377_v23, %v379_v22 }
 0x32d   :  { %713 = vrsqrt.f32 %v386_v24  ;;  %v383_v26 = vmax.f32 %v381_v25, 0.0 }
 0x32f   :  { %v387_v27 = vadd.f32 0.001, %v383_v26 }
 0x331   :  { %715 = vrsqrt.f32 %v387_v27 }
 0x33a   :  { %v714_v28 = vpop.eup %713 }
 0x33b   :  { %v390_v30 = vmul.f32 %v714_v28, %v384_v0 }
 0x33d   :  { %v398_v33 = vmul.f32 %v571_v29, %v390_v30 }
 0x33e   :  { %v716_v34 = vpop.eup %715 }
 0x33f   :  { %v391_v35 = vmul.f32 %v716_v34, %v385_v32  ;;  %v406_v36 = vadd.f32 %v572_v31, %v398_v33 }
 0x341   :  { %v399_v37 = vmul.f32 %v571_v29, %v391_v35  ;;  %v408_v38 = vmul.f32 0.5, %v406_v36 }
 0x343   :  { %v407_v39 = vadd.f32 %v572_v31, %v399_v37  ;;  %717 = vtanh.f32 %v408_v38 }
 0x345   :  { %v409_v40 = vmul.f32 0.5, %v407_v39 }
 0x347   :  { %719 = vtanh.f32 %v409_v40 }
 0x350   :  { %v718_v41 = vpop.eup %717 }
 0x351   :  { %v412_v42 = vadd.f32 1.0, %v718_v41 }
 0x353   :  { %v414_v45 = vmul.f32 %v412_v42, %v408_v38 }
 0x354   :  { %v720_v43 = vpop.eup %719 }
 0x355   :  { %v413_v44 = vadd.f32 1.0, %v720_v43 }
 0x357   :  { %v415_v46 = vmul.f32 %v413_v44, %v409_v40 }
 0x359   :  { %v416_v47 = vpack.c.bf16 %v415_v46, %v414_v45 }
 0x35b   :  { %666 = vmatmul.mubr.bf16.vlgmr.msra.gmra.mxu0 %v416_v47 }
 0x41b   :  { %v522_v49 = vpop.f32.mrf.mxu0 }
 0x41c   :  { %v523_v50 = vadd.f32 %v573_v48, %v522_v49 }
 0x41d   :  { %v667_v51 = vpop.f32.mrf.mxu0 }
 0x41e   :  { %721 = vtanh.f32 %v523_v50 }
 0x41f   :  { %v525_v52 = vpop.f32.mrf.mxu0 }
 0x420   :  { %v526_v53 = vadd.f32 %v573_v48, %v525_v52 }
 0x421   :  { %v668_v54 = vpop.f32.mrf.mxu0 }
 0x422   :  { %723 = vtanh.f32 %v526_v53 }
 0x42b   :  { %v722_v55 = vpop.eup %721 }
 0x42c   :  { %531 = vst [vmem:[#allocation10] sm:$0xff] %v722_v55 }
 0x42f   :  { %v724_v56 = vpop.eup %723 }
 0x430   :  { %532 = vst [vmem:[#allocation10 + $0x8] sm:$0xff] %v724_v56 }
 0x431   :  { %816 = shalt.err (!%p813_p10)
}
 0x432   :  { %s842_s8 = smov 128   ;;  %s843_s15 = smov 8  }
 0x433   :  { %544 = dma.vmem_to_hbm [thread:$0]  %s539_s13, 256, %s975_s9, [#allocation4], %s842_s8, %s842_s8, %s843_s15  }
 0x434   :  { %831 = dma.done.wait [#allocation4], 256  }
 0x435   :  { %832 = vsyncadd [#allocation4], 4294967040 }
 0x436   :  { %548 = vsyncpa [#allocation3], 1 }
 0x437   :  { %549 = vsyncpa [#allocation6], 1 }
 0x438   :  { %550 = vsyncpa [#allocation9], 1 }
 0x439   :  { %551 = vsyncpa [#allocation4], 1 }

</bundles_post_ra>
